<compile_context>
chip_gen: v7x
topology: tpu7x:2x2x1
jax: 0.10.0
libtpu: 0.0.40
codegen_flags: <defaults>
</compile_context>

<pallas_src>
import numpy as np
import jax
import jax.numpy as jnp
from jax.experimental import pallas as pl
from jax.experimental.pallas import tpu as pltpu


# ----------------------------------------------------------------------------
# Host-side Hungarian (min-cost assignment on a square matrix, Kuhn-Munkres)
# ----------------------------------------------------------------------------
def _hungarian_min_square(cost: np.ndarray) -> np.ndarray:
    """Returns row_of_col: row index assigned to each column (square cost)."""
    n = cost.shape[0]
    INF = 1e18
    u = np.zeros(n + 1)
    v = np.zeros(n + 1)
    p = np.zeros(n + 1, dtype=np.int64)
    way = np.zeros(n + 1, dtype=np.int64)
    for i in range(1, n + 1):
        p[0] = i
        j0 = 0
        minv = np.full(n + 1, INF)
        used = np.zeros(n + 1, dtype=bool)
        while True:
            used[j0] = True
            i0 = p[j0]
            delta = INF
            j1 = -1
            for j in range(1, n + 1):
                if not used[j]:
                    cur = cost[i0 - 1, j - 1] - u[i0] - v[j]
                    if cur < minv[j]:
                        minv[j] = cur
                        way[j] = j0
                    if minv[j] < delta:
                        delta = minv[j]
                        j1 = j
            for j in range(n + 1):
                if used[j]:
                    u[p[j]] += delta
                    v[j] -= delta
                else:
                    minv[j] -= delta
            j0 = j1
            if p[j0] == 0:
                break
        while True:
            j1 = way[j0]
            p[j0] = p[j1]
            j0 = j1
            if j0 == 0:
                break
    return p[1:] - 1  # row assigned to each column (0-indexed)


def hungarian_assign(pred: np.ndarray, src_ns: np.ndarray, tgt_ns: np.ndarray) -> np.ndarray:
    """Batched maximize-profit Hungarian -> compact (B, N1) int32 assigned column
    per row (-1 when the row gets no column)."""
    b, n1, n2 = pred.shape
    out = np.full((b, n1), -1, dtype=np.int32)
    for bi in range(b):
        s, t = int(src_ns[bi]), int(tgt_ns[bi])
        if s == 0 or t == 0:
            continue
        profit = pred[bi, :s, :t].astype(np.float64)
        n = max(s, t)
        cost = np.zeros((n, n), dtype=np.float64)
        cost[:s, :t] = -profit  # maximize profit == minimize negative profit
        row_of_col = _hungarian_min_square(cost)
        for j in range(t):
            r = int(row_of_col[j])
            if r < s:
                out[bi, r] = j
    return out


# ----------------------------------------------------------------------------
# Pallas kernel: Hungarian-attention masked clamped BCE, per-tile partial sums
# ----------------------------------------------------------------------------
def _hung_bce_kernel(src_s_ref, tgt_s_ref,           # scalar-prefetch (SMEM), shape (Bp,)
                     pred_ref, gt_ref, asn_ref,      # (BT,N1,N2), (BT,N1,N2), (BT,N1,1)
                     srcb_ref, tgtb_ref,             # (BT,1,1) int32 bounds for the mask
                     out_ref):                       # (1,N1,N2) f32 partial sums
    bt, n1, n2 = pred_ref.shape
    base = pl.program_id(0) * bt

    # Skip tiles whose batch items are all empty (src_ns == 0 or tgt_ns == 0).
    nonempty = (src_s_ref[base] > 0) & (tgt_s_ref[base] > 0)
    for j in range(1, bt):  # bt is static -> unrolled scalar ops
        nonempty |= (src_s_ref[base + j] > 0) & (tgt_s_ref[base + j] > 0)

    @pl.when(nonempty)
    def _():
        pred = pred_ref[...].astype(jnp.float32)          # (BT, N1, N2)
        gt = gt_ref[...].astype(jnp.float32)              # (BT, N1, N2) in [0, 1]
        asn = asn_ref[...]                                # (BT, N1, 1) int32, -1 = none
        src_b = srcb_ref[...]                             # (BT, 1, 1) int32
        tgt_b = tgtb_ref[...]                             # (BT, 1, 1) int32

        row = jax.lax.broadcasted_iota(jnp.int32, (bt, n1, n2), 1)
        col = jax.lax.broadcasted_iota(jnp.int32, (bt, n1, n2), 2)
        valid = (row < src_b) & (col < tgt_b)             # per-batch [0:s, 0:t] rectangle

        # Hungarian(S) reconstructed from the compact column indices (one-hot rows).
        dis = (col == asn).astype(jnp.float32)
        # Z = min(dis + gt, 1);  p = Z * pred;  g = Z * gt   (matches the reference).
        ali = jnp.minimum(dis + gt, 1.0)
        p = ali * pred
        g = ali * gt

        # F.binary_cross_entropy clamps each log term at -100 (so Z == 0 -> 0 loss).
        lp = jnp.maximum(jnp.log(p), -100.0)
        l1p = jnp.maximum(jnp.log(1.0 - p), -100.0)
        bce = -(g * lp + (1.0 - g) * l1p)

        # Reduce only over the batch-tile axis (cheap VPU adds across vregs);
        # the cross-lane reduction happens once, in the wrapper.
        out_ref[...] = jnp.sum(jnp.where(valid, bce, 0.0), axis=0, keepdims=True)

    @pl.when(jnp.logical_not(nonempty))
    def _():
        out_ref[...] = jnp.zeros_like(out_ref)


def _pick_batch_tile(b: int, n1: int, n2: int, gt_itemsize: int) -> int:
    """Batch-tile size: big enough to amortize per-step overhead, small enough for
    default scoped VMEM (double-buffered), preferring divisors of B (no pad copy)."""
    bytes_per_item = n1 * n2 * (4 + gt_itemsize) + (n1 + 2) * 4
    budget = 4 * 1024 * 1024
    bt_cap = max(1, min(32, budget // max(1, bytes_per_item)))
    bt_cap = min(bt_cap, b)
    best_div = max(d for d in range(1, bt_cap + 1) if b % d == 0)
    if best_div * 2 >= bt_cap:
        return best_div
    # Fall back to padding: keep the step count of bt_cap but minimize pad amount.
    g = -(-b // bt_cap)
    return -(-b // g)


def permutation_loss_hung(pred_dsmat, gt_perm, src_ns, tgt_ns):
    """JAX wrapper reproducing PermutationLossHung.forward (returns a scalar)."""
    b, n1, n2 = pred_dsmat.shape

    # Host-side Hungarian (combinatorial glue). Only pred makes the D2H trip; the
    # result goes back as compact (B, N1) column indices (no dense dis matrix).
    pred_np = np.asarray(jax.device_get(pred_dsmat), dtype=np.float32)
    src_np = np.asarray(jax.device_get(src_ns), dtype=np.int32)
    tgt_np = np.asarray(jax.device_get(tgt_ns), dtype=np.int32)
    asn_np = hungarian_assign(pred_np, src_np, tgt_np)        # (B, N1) int32

    gt_itemsize = jnp.dtype(gt_perm.dtype).itemsize
    bt = _pick_batch_tile(b, n1, n2, gt_itemsize)
    g = -(-b // bt)          # cdiv
    bp = g * bt

    pred_f = pred_dsmat.astype(jnp.float32)
    gt_in = gt_perm          # dtype-agnostic in-kernel; pass int8/bf16 upstream to cut HBM traffic
    if bp != b:
        pad = ((0, bp - b), (0, 0), (0, 0))
        pred_f = jnp.pad(pred_f, pad)
        gt_in = jnp.pad(gt_in, pad)

    asn_h = np.full((bp, n1, 1), -1, dtype=np.int32)
    asn_h[:b, :, 0] = asn_np
    src_h = np.zeros((bp,), dtype=np.int32)
    src_h[:b] = src_np
    tgt_h = np.zeros((bp,), dtype=np.int32)
    tgt_h[:b] = tgt_np

    bytes_accessed = int(bp * n1 * n2 * (4 + gt_itemsize)     # pred + gt
                         + bp * (n1 + 4) * 4                  # assign + bounds + prefetch
                         + g * n1 * n2 * 4)                   # partial-sum output

    partial = pl.pallas_call(
        _hung_bce_kernel,
        out_shape=jax.ShapeDtypeStruct((g, n1, n2), jnp.float32),
        grid_spec=pltpu.PrefetchScalarGridSpec(
            num_scalar_prefetch=2,
            grid=(g,),
            in_specs=[
                pl.BlockSpec((bt, n1, n2), lambda i, s, t: (i, 0, 0)),   # pred
                pl.BlockSpec((bt, n1, n2), lambda i, s, t: (i, 0, 0)),   # gt
                pl.BlockSpec((bt, n1, 1),  lambda i, s, t: (i, 0, 0)),   # assigned cols
                pl.BlockSpec((bt, 1, 1),   lambda i, s, t: (i, 0, 0)),   # src bounds
                pl.BlockSpec((bt, 1, 1),   lambda i, s, t: (i, 0, 0)),   # tgt bounds
            ],
            out_specs=pl.BlockSpec((1, n1, n2), lambda i, s, t: (i, 0, 0)),
        ),
        compiler_params=pltpu.CompilerParams(
            dimension_semantics=("parallel",)),
        cost_estimate=pl.CostEstimate(
            flops=12 * bp * n1 * n2,
            transcendentals=2 * bp * n1 * n2,
            bytes_accessed=bytes_accessed),
    )(jnp.asarray(src_h), jnp.asarray(tgt_h),
      pred_f, gt_in,
      jnp.asarray(asn_h),
      jnp.asarray(src_h.reshape(bp, 1, 1)),
      jnp.asarray(tgt_h.reshape(bp, 1, 1)))

    loss_sum = jnp.sum(partial)
    # NOTE: like the reference module, an all-empty batch (n_sum == 0) yields nan.
    n_sum = jnp.sum(src_ns.astype(jnp.float32))
    return (loss_sum / n_sum).reshape(())


# ----------------------------------------------------------------------------
# Pure-numpy reference (mirrors the PyTorch forward, two-term BCE in float64)
# ----------------------------------------------------------------------------
def _reference(pred, gt, src_ns, tgt_ns):
    pred = np.asarray(pred, dtype=np.float64)
    gt = np.asarray(gt, dtype=np.float64)
    b, n1, n2 = pred.shape
    asn = hungarian_assign(pred.astype(np.float32), src_ns, tgt_ns)
    dis = np.zeros_like(pred)
    for bi in range(b):
        for r in range(n1):
            j = int(asn[bi, r])
            if j >= 0:
                dis[bi, r, j] = 1.0
    ali = np.minimum(dis + gt, 1.0)
    p = ali * pred
    g = ali * gt
    loss = 0.0
    n_sum = 0.0
    for bi in range(b):
        s, t = int(src_ns[bi]), int(tgt_ns[bi])
        pb = p[bi, :s, :t]
        gb = g[bi, :s, :t]
        lp = np.maximum(np.log(np.where(pb > 0, pb, 1e-300)), -100.0)
        l1p = np.maximum(np.log(np.where(1 - pb > 0, 1 - pb, 1e-300)), -100.0)
        loss += np.sum(-(gb * lp + (1 - gb) * l1p))
        n_sum += s
    return loss / n_sum


if __name__ == "__main__":
    key = jax.random.PRNGKey(0)
    B, N1, N2 = 2, 8, 8
    k1, k2 = jax.random.split(key)

    # Pred: row-stochastic matrix (entries in [0,1]) per batch.
    raw = jax.random.uniform(k1, (B, N1, N2), dtype=jnp.float32, minval=0.05, maxval=1.0)
    pred_dsmat = raw / jnp.sum(raw, axis=-1, keepdims=True)

    # Variable node counts per batch instance.
    src_ns = jnp.array([8, 6], dtype=jnp.int32)
    tgt_ns = jnp.array([8, 7], dtype=jnp.int32)

    # Ground-truth permutation matrices within the valid slices.
    gt_np = np.zeros((B, N1, N2), dtype=np.float32)
    perms = [np.random.RandomState(0).permutation(8),
             np.random.RandomState(1).permutation(7)[:6]]
    for bb in range(B):
        s = int(src_ns[bb])
        for i in range(s):
            gt_np[bb, i, int(perms[bb][i])] = 1.0
    gt_perm = jnp.asarray(gt_np)

    loss = permutation_loss_hung(pred_dsmat, gt_perm, src_ns, tgt_ns)
    loss = jax.block_until_ready(loss)

    ref = _reference(np.asarray(pred_dsmat), gt_np,
                     np.asarray(src_ns), np.asarray(tgt_ns))
    assert np.allclose(float(loss), ref, rtol=1e-4, atol=1e-4), (float(loss), ref)
    print("KERNEL_OK")
</pallas_src>

<mosaic_0001>
module attributes {stable_mosaic.version = 11 : i64} {
  func.func @_hung_bce_kernel(%arg0: i32, %arg1: memref<2xi32, #tpu.memory_space<smem>>, %arg2: memref<2xi32, #tpu.memory_space<smem>>, %arg3: memref<2x8x8xf32, #tpu.memory_space<vmem>>, %arg4: memref<2x8x8xf32, #tpu.memory_space<vmem>>, %arg5: memref<2x8x1xi32, #tpu.memory_space<vmem>>, %arg6: memref<2x1x1xi32, #tpu.memory_space<vmem>>, %arg7: memref<2x1x1xi32, #tpu.memory_space<vmem>>, %arg8: memref<1x8x8xf32, #tpu.memory_space<vmem>>) attributes {dimension_semantics = [#tpu.dimension_semantics<parallel>], iteration_bounds = array<i64: 1>, scalar_prefetch = 2 : i64, scratch_operands = 0 : i64, tpu.core_type = #tpu.core_type<tc>, window_params = [{transform_indices = @transform_0, window_bounds = array<i64: 2, 8, 8>}, {transform_indices = @transform_1, window_bounds = array<i64: 2, 8, 8>}, {transform_indices = @transform_2, window_bounds = array<i64: 2, 8, 1>}, {transform_indices = @transform_3, window_bounds = array<i64: 2, 1, 1>}, {transform_indices = @transform_4, window_bounds = array<i64: 2, 1, 1>}, {transform_indices = @transform_5, window_bounds = array<i64: 1, 8, 8>}]} {
    %c2_i32 = arith.constant 2 : i32
    %0 = arith.muli %arg0, %c2_i32 : i32
    %1 = arith.index_cast %0 : i32 to index
    %2 = memref.load %arg1[%1] : memref<2xi32, #tpu.memory_space<smem>>
    %c0_i32 = arith.constant 0 : i32
    %3 = arith.cmpi sgt, %2, %c0_i32 : i32
    %4 = arith.index_cast %0 : i32 to index
    %5 = memref.load %arg2[%4] : memref<2xi32, #tpu.memory_space<smem>>
    %c0_i32_0 = arith.constant 0 : i32
    %6 = arith.cmpi sgt, %5, %c0_i32_0 : i32
    %7 = arith.andi %3, %6 : i1
    %c1_i32 = arith.constant 1 : i32
    %8 = arith.addi %0, %c1_i32 : i32
    %9 = arith.index_cast %8 : i32 to index
    %10 = memref.load %arg1[%9] : memref<2xi32, #tpu.memory_space<smem>>
    %c0_i32_1 = arith.constant 0 : i32
    %11 = arith.cmpi sgt, %10, %c0_i32_1 : i32
    %c1_i32_2 = arith.constant 1 : i32
    %12 = arith.addi %0, %c1_i32_2 : i32
    %13 = arith.index_cast %12 : i32 to index
    %14 = memref.load %arg2[%13] : memref<2xi32, #tpu.memory_space<smem>>
    %c0_i32_3 = arith.constant 0 : i32
    %15 = arith.cmpi sgt, %14, %c0_i32_3 : i32
    %16 = arith.andi %11, %15 : i1
    %17 = arith.ori %7, %16 : i1
    %18 = arith.extui %17 : i1 to i32
    %c0_i32_4 = arith.constant 0 : i32
    %19 = arith.cmpi ne, %18, %c0_i32_4 : i32
    scf.if %19 {
      %c0 = arith.constant 0 : index
      %c0_6 = arith.constant 0 : index
      %c0_7 = arith.constant 0 : index
      %23 = vector.load %arg3[%c0, %c0_6, %c0_7] : memref<2x8x8xf32, #tpu.memory_space<vmem>>, vector<2x8x8xf32>
      %c0_8 = arith.constant 0 : index
      %c0_9 = arith.constant 0 : index
      %c0_10 = arith.constant 0 : index
      %24 = vector.load %arg4[%c0_8, %c0_9, %c0_10] : memref<2x8x8xf32, #tpu.memory_space<vmem>>, vector<2x8x8xf32>
      %c0_11 = arith.constant 0 : index
      %c0_12 = arith.constant 0 : index
      %c0_13 = arith.constant 0 : index
      %25 = vector.load %arg5[%c0_11, %c0_12, %c0_13] : memref<2x8x1xi32, #tpu.memory_space<vmem>>, vector<2x8x1xi32>
      %c0_14 = arith.constant 0 : index
      %c0_15 = arith.constant 0 : index
      %c0_16 = arith.constant 0 : index
      %26 = vector.load %arg6[%c0_14, %c0_15, %c0_16] : memref<2x1x1xi32, #tpu.memory_space<vmem>>, vector<2x1x1xi32>
      %c0_17 = arith.constant 0 : index
      %c0_18 = arith.constant 0 : index
      %c0_19 = arith.constant 0 : index
      %27 = vector.load %arg7[%c0_17, %c0_18, %c0_19] : memref<2x1x1xi32, #tpu.memory_space<vmem>>, vector<2x1x1xi32>
      %28 = tpu.iota {dimensions = array<i32: 1>} : vector<2x8x8xi32>
      %29 = tpu.iota {dimensions = array<i32: 2>} : vector<2x8x8xi32>
      %30 = vector.broadcast %26 : vector<2x1x1xi32> to vector<2x8x8xi32>
      %31 = arith.cmpi slt, %28, %30 : vector<2x8x8xi32>
      %32 = vector.broadcast %27 : vector<2x1x1xi32> to vector<2x8x8xi32>
      %33 = arith.cmpi slt, %29, %32 : vector<2x8x8xi32>
      %34 = arith.andi %31, %33 : vector<2x8x8xi1>
      %35 = vector.broadcast %25 : vector<2x8x1xi32> to vector<2x8x8xi32>
      %36 = arith.cmpi eq, %29, %35 : vector<2x8x8xi32>
      %37 = arith.extui %36 : vector<2x8x8xi1> to vector<2x8x8xi32>
      %38 = arith.sitofp %37 : vector<2x8x8xi32> to vector<2x8x8xf32>
      %39 = arith.addf %38, %24 : vector<2x8x8xf32>
      %cst = arith.constant 1.000000e+00 : f32
      %40 = vector.broadcast %cst : f32 to vector<2x8x8xf32>
      %41 = arith.minimumf %39, %40 : vector<2x8x8xf32>
      %42 = arith.mulf %41, %23 : vector<2x8x8xf32>
      %43 = arith.mulf %41, %24 : vector<2x8x8xf32>
      %44 = math.log %42 : vector<2x8x8xf32>
      %cst_20 = arith.constant -1.000000e+02 : f32
      %45 = vector.broadcast %cst_20 : f32 to vector<2x8x8xf32>
      %46 = arith.maximumf %44, %45 : vector<2x8x8xf32>
      %cst_21 = arith.constant 1.000000e+00 : f32
      %47 = vector.broadcast %cst_21 : f32 to vector<2x8x8xf32>
      %48 = arith.subf %47, %42 : vector<2x8x8xf32>
      %49 = math.log %48 : vector<2x8x8xf32>
      %cst_22 = arith.constant -1.000000e+02 : f32
      %50 = vector.broadcast %cst_22 : f32 to vector<2x8x8xf32>
      %51 = arith.maximumf %49, %50 : vector<2x8x8xf32>
      %52 = arith.mulf %43, %46 : vector<2x8x8xf32>
      %cst_23 = arith.constant 1.000000e+00 : f32
      %53 = vector.broadcast %cst_23 : f32 to vector<2x8x8xf32>
      %54 = arith.subf %53, %43 : vector<2x8x8xf32>
      %55 = arith.mulf %54, %51 : vector<2x8x8xf32>
      %56 = arith.addf %52, %55 : vector<2x8x8xf32>
      %cst_24 = arith.constant 0.000000e+00 : f32
      %57 = vector.broadcast %cst_24 : f32 to vector<2x8x8xf32>
      %58 = arith.subf %57, %56 : vector<2x8x8xf32>
      %cst_25 = arith.constant 0.000000e+00 : f32
      %59 = vector.broadcast %cst_25 : f32 to vector<2x8x8xf32>
      %60 = arith.select %34, %58, %59 : vector<2x8x8xi1>, vector<2x8x8xf32>
      %cst_26 = arith.constant dense<0.000000e+00> : vector<8x8xf32>
      %61 = vector.multi_reduction <add>, %60, %cst_26 [0] : vector<2x8x8xf32> to vector<8x8xf32>
      %62 = vector.shape_cast %61 : vector<8x8xf32> to vector<1x8x8xf32>
      %c0_27 = arith.constant 0 : index
      %c0_28 = arith.constant 0 : index
      %c0_29 = arith.constant 0 : index
      %63 = vector.load %arg8[%c0_27, %c0_28, %c0_29] : memref<1x8x8xf32, #tpu.memory_space<vmem>>, vector<1x8x8xf32>
      tpu.vector_store %arg8[%c0_27, %c0_28, %c0_29], %62 {strides = array<i32>} : memref<1x8x8xf32, #tpu.memory_space<vmem>>, vector<1x8x8xf32>,
    } else {
    }
    %true = arith.constant true
    %20 = arith.xori %17, %true : i1
    %21 = arith.extui %20 : i1 to i32
    %c0_i32_5 = arith.constant 0 : i32
    %22 = arith.cmpi ne, %21, %c0_i32_5 : i32
    scf.if %22 {
      %cst = arith.constant 0.000000e+00 : f32
      %23 = vector.broadcast %cst : f32 to vector<1x8x8xf32>
      %c0 = arith.constant 0 : index
      %c0_6 = arith.constant 0 : index
      %c0_7 = arith.constant 0 : index
      %24 = vector.load %arg8[%c0, %c0_6, %c0_7] : memref<1x8x8xf32, #tpu.memory_space<vmem>>, vector<1x8x8xf32>
      tpu.vector_store %arg8[%c0, %c0_6, %c0_7], %23 {strides = array<i32>} : memref<1x8x8xf32, #tpu.memory_space<vmem>>, vector<1x8x8xf32>,
    } else {
    }
    return
  }
  func.func @transform_0(%arg0: i32, %arg1: memref<2xi32, #tpu.memory_space<smem>>, %arg2: memref<2xi32, #tpu.memory_space<smem>>) -> (i32, i32, i32) {
    %c0_i32 = arith.constant 0 : i32
    %c0_i32_0 = arith.constant 0 : i32
    %c0_i32_1 = arith.constant 0 : i32
    return %arg0, %c0_i32, %c0_i32_0 : i32, i32, i32
  }
  func.func @transform_1(%arg0: i32, %arg1: memref<2xi32, #tpu.memory_space<smem>>, %arg2: memref<2xi32, #tpu.memory_space<smem>>) -> (i32, i32, i32) {
    %c0_i32 = arith.constant 0 : i32
    %c0_i32_0 = arith.constant 0 : i32
    %c0_i32_1 = arith.constant 0 : i32
    return %arg0, %c0_i32, %c0_i32_0 : i32, i32, i32
  }
  func.func @transform_2(%arg0: i32, %arg1: memref<2xi32, #tpu.memory_space<smem>>, %arg2: memref<2xi32, #tpu.memory_space<smem>>) -> (i32, i32, i32) {
    %c0_i32 = arith.constant 0 : i32
    %c0_i32_0 = arith.constant 0 : i32
    %c0_i32_1 = arith.constant 0 : i32
    return %arg0, %c0_i32, %c0_i32_0 : i32, i32, i32
  }
  func.func @transform_3(%arg0: i32, %arg1: memref<2xi32, #tpu.memory_space<smem>>, %arg2: memref<2xi32, #tpu.memory_space<smem>>) -> (i32, i32, i32) {
    %c0_i32 = arith.constant 0 : i32
    %c0_i32_0 = arith.constant 0 : i32
    %c0_i32_1 = arith.constant 0 : i32
    return %arg0, %c0_i32, %c0_i32_0 : i32, i32, i32
  }
  func.func @transform_4(%arg0: i32, %arg1: memref<2xi32, #tpu.memory_space<smem>>, %arg2: memref<2xi32, #tpu.memory_space<smem>>) -> (i32, i32, i32) {
    %c0_i32 = arith.constant 0 : i32
    %c0_i32_0 = arith.constant 0 : i32
    %c0_i32_1 = arith.constant 0 : i32
    return %arg0, %c0_i32, %c0_i32_0 : i32, i32, i32
  }
  func.func @transform_5(%arg0: i32, %arg1: memref<2xi32, #tpu.memory_space<smem>>, %arg2: memref<2xi32, #tpu.memory_space<smem>>) -> (i32, i32, i32) {
    %c0_i32 = arith.constant 0 : i32
    %c0_i32_0 = arith.constant 0 : i32
    %c0_i32_1 = arith.constant 0 : i32
    return %arg0, %c0_i32, %c0_i32_0 : i32, i32, i32
  }
}

</mosaic_0001>

<bundles_post_ra>
// kernel: tpu_custom_call.1
= control target key start
LH: loop header
LB: loop body
LE: loop exit
PB: predicated region body
PF: predicated region fallthrough
CT: control target
= control target key end

     0   :  { %s350_s0 = inlined_call_operand.vmem [shape: s32[2], index: 0, kind: input, shape index: {}]   ;;  %s351_s2 = inlined_call_operand.vmem [shape: f32[2,8,8], index: 2, kind: input, shape index: {}]   ;;  %s352_s3 = inlined_call_operand.vmem [shape: f32[2,8,8], index: 3, kind: input, shape index: {}]   ;;  %s353_s4 = inlined_call_operand.vmem [shape: s32[2,8,1], index: 4, kind: input, shape index: {}]   ;;  %s354_s5 = inlined_call_operand.vmem [shape: s32[2,1,1], index: 5, kind: input, shape index: {}]   ;;  %s355_s6 = inlined_call_operand.vmem [shape: s32[2,1,1], index: 6, kind: input, shape index: {}]   ;;  %s356_s7 = inlined_call_operand.hbm [shape: f32[1,8,8], index: 7, kind: output, shape index: {}]   ;;  %s357_s1 = inlined_call_operand.hbm [shape: s32[2], index: 1, kind: input, shape index: {}]  }
   0x1   :  { %s12_s26 = sshll.u32 %s350_s0, 4  ;;  %s13_s26 = int_to_ptr.vmem [resolvable:$true] %s12_s26 }
   0x2   :  { %s191_s27 = scalar_lea.vmem %s13_s26, 16  ;;  %p196_p1 = scmp.lt.s32.totalorder %s13_s26, %s13_s26 }
   0x3   :  { %p192_p0 = scmp.ne.s32.totalorder %s13_s26, %s191_s27  ;;  %p197_p2 = scmp.lt.s32.totalorder %s191_s27, %s191_s27 }
   0x5   :  { %p198_p3 = por %p197_p2, %p196_p1 }
   0x7   :  { %p199_p4 = pnand %p198_p3, %p192_p0 }
   0x9   :  { %202 = shalt.err (!%p199_p4)  }
   0xa   :  { %s239_s28 = smov [#allocation3]   ;;  %s203_s8 = scalar_lea.hbm %s357_s1, 16 }
   0xb   :  { %15 = dma.vmem_to_smem %s13_s26, 16, %s239_s28, [#allocation2] }
   0xc   :  { %p204_p5 = scmp.ne.s32.totalorder %s357_s1, %s203_s8  ;;  %p207_p6 = scmp.lt.u32.totalorder %s203_s8, %s357_s1 }
   0xe   :  { %p209_p7 = pnand %p207_p6, %p204_p5 }
  0x10   :  { %212 = shalt.err (!%p209_p7)  }
  0x11   :  { %s240_s12 = smov [#allocation4]  }
  0x12   :  { %17 = dma.hbm_to_smem %s357_s1, 16, %s240_s12, [#allocation2] }
  0x13   :  { %235 = dma.done.wait [#allocation2], 32 }
  0x14   :  { %236 = vsyncadd [#allocation2], 4294967264 }
  0x15   :  { %19 = sfence }
  0x16   :  { %20 = vsyncpa [#allocation6], 0  ;;  %s32_s15 = sld [smem:[#allocation3]]  ;;  %s167_s17 = sld [smem:[#allocation3 + $0x1]] }
  0x17   :  { %s34_s16 = sld [smem:[#allocation4]]  ;;  %s168_s18 = sld [smem:[#allocation4 + $0x1]] }
  0x1c   :  { %p33_p8 = scmp.gt.s32.totalorder %s32_s15, 0  ;;  %p40_p10 = scmp.gt.s32.totalorder %s167_s17, 0 }
  0x1d   :  { %p35_p9 = scmp.gt.s32.totalorder %s34_s16, 0  ;;  %p42_p11 = scmp.gt.s32.totalorder %s168_s18, 0 }
  0x1f   :  { %p36_p12 = pnand %p35_p9, %p33_p8  ;;  %p43_p13 = pnand %p42_p11, %p40_p10 }
  0x21   :  { %p37_p0 = pneg %p36_p12  ;;  %p44_p1 = pneg %p43_p13 }
  0x23   :  { %p300_p2 = por %p44_p1, %p37_p0 }
  0x24   :  { %v53_v0 = vld [vmem:[%s353_s4] sm:$0xff] (%p300_p2)  ;;  %v241_v2 = vmov (%p300_p2), 0   ;;  %v54_v3 = vld [vmem:[%s353_s4 + $0x8] sm:$0xff] (%p300_p2)  ;;  %v59_v7 = vlaneseq (%p300_p2)  ;;  %v242_v11 = vmov (%p300_p2), 0.0   ;;  %vm143_vm7 = vcmask (%p300_p2), 64512  }
  0x25   :  { %48 = sbr.rel (!%p300_p2) target bundleno = 206 (0xce), region = 25  ;;  %v169_v1 = vld [vmem:[%s354_s5] ss:$0 sm:$0xff] (%p300_p2)  ;;  %181 = vset.pattern.permute.xlu0 (%p300_p2), %v241_v2  ;;  %182 = vset.pattern.permute.xlu1 (%p300_p2), %v241_v2  ;;  %v170_v4 = vld [vmem:[%s354_s5 + $0x1] ss:$0 sm:$0xff] (%p300_p2)  ;;  %v52_v16 = vld [vmem:[%s352_s3 + $0x8] sm:$0xff] (%p300_p2) }
  0x26   :  { %98 = vperm.xlu0 (%p300_p2), %181, %v53_v0   ;;  %72 = vperm.xlu1 (%p300_p2), %182, %v169_v1   ;;  %v171_v5 = vld [vmem:[%s355_s6] ss:$0 sm:$0xff] (%p300_p2)  ;;  %v172_v6 = vld [vmem:[%s355_s6 + $0x1] ss:$0 sm:$0xff] (%p300_p2)  ;;  %v62_v8 = vand.u32 (%p300_p2), 127, %v59_v7  ;;  %v50_v21 = vld [vmem:[%s351_s2 + $0x8] sm:$0xff] (%p300_p2) }
  0x27   :  { %v51_v10 = vld [vmem:[%s352_s3] sm:$0xff] (%p300_p2)  ;;  %v60_v40 = vshrl.u32 (%p300_p2), %v59_v7, 7 }
  0x28   :  { %v49_v14 = vld [vmem:[%s351_s2] sm:$0xff] (%p300_p2) }
  0x2a   :  { %101 = vperm.xlu0 (%p300_p2), %181, %v54_v3   ;;  %75 = vperm.xlu1 (%p300_p2), %182, %v170_v4  }
  0x2e   :  { %88 = vperm.xlu0 %181, %v171_v5   ;;  %91 = vperm.xlu1 %182, %v172_v6  }
  0xa5   :  { %v99_v9 = vpop.permute.xlu0 %98  ;;  %v73_v27 = vpop.permute.xlu1 %72 }
  0xa6   :  { %vm103_vm0 = vcmp.eq.s32.totalorder %v62_v8, %v99_v9  ;;  %vm77_vm2 = vcmp.lt.s32.totalorder %v60_v40, %v73_v27 }
  0xa7   :  { %v173_v12 = vsel %vm103_vm0, 1.0, %v242_v11 }
  0xa8   :  { %v109_v13 = vadd.f32 %v173_v12, %v51_v10 }
  0xa9   :  { %v102_v15 = vpop.permute.xlu0 %101  ;;  %v76_v34 = vpop.permute.xlu1 %75 }
  0xaa   :  { %v111_v17 = vmin.f32 %v109_v13, 1.0  ;;  %vm104_vm1 = vcmp.eq.s32.totalorder %v62_v8, %v102_v15  ;;  %vm78_vm4 = vcmp.lt.s32.totalorder %v60_v40, %v76_v34 }
  0xab   :  { %v174_v18 = vsel %vm104_vm1, 1.0, %v242_v11 }
  0xac   :  { %v113_v19 = vmul.f32 %v111_v17, %v49_v14  ;;  %v110_v20 = vadd.f32 %v174_v18, %v52_v16  ;;  %v115_v28 = vmul.f32 %v111_v17, %v51_v10 }
  0xad   :  { %v89_v45 = vpop.permute.xlu0 %88  ;;  %v92_v49 = vpop.permute.xlu1 %91 }
  0xae   :  { %183 = vlog2.f32 %v113_v19  ;;  %v123_v22 = vsub.f32 1.0, %v113_v19  ;;  %v112_v23 = vmin.f32 %v110_v20, 1.0  ;;  %v133_v35 = vsub.f32 1.0, %v115_v28 }
  0xaf   :  { %vm93_vm3 = vcmp.lt.s32.totalorder %v62_v8, %v89_v45  ;;  %vm94_vm5 = vcmp.lt.s32.totalorder %v62_v8, %v92_v49 }
  0xb0   :  { %185 = vlog2.f32 %v123_v22  ;;  %v114_v24 = vmul.f32 %v112_v23, %v50_v21  ;;  %v116_v36 = vmul.f32 %v112_v23, %v52_v16  ;;  %vm95_vm6 = vmand %vm77_vm2, %vm93_vm3 }
  0xb1   :  { %vm96_vm8 = vmand %vm78_vm4, %vm94_vm5 }
  0xb2   :  { %187 = vlog2.f32 %v114_v24  ;;  %v124_v25 = vsub.f32 1.0, %v114_v24  ;;  %v134_v46 = vsub.f32 1.0, %v116_v36 }
  0xb4   :  { %189 = vlog2.f32 %v124_v25 }
  0xb8   :  { %v184_v26 = vpop.eup %183 }
  0xb9   :  { %v118_v29 = vmul.f32 0.6931472, %v184_v26 }
  0xba   :  { %v186_v30 = vpop.eup %185 }
  0xbb   :  { %v121_v31 = vmax.f32 %v118_v29, -100.0  ;;  %v126_v32 = vmul.f32 0.6931472, %v186_v30 }
  0xbc   :  { %v188_v33 = vpop.eup %187 }
  0xbd   :  { %v120_v37 = vmul.f32 0.6931472, %v188_v33  ;;  %v129_v38 = vmax.f32 %v126_v32, -100.0  ;;  %v131_v41 = vmul.f32 %v121_v31, %v115_v28 }
  0xbe   :  { %v190_v39 = vpop.eup %189 }
  0xbf   :  { %v122_v42 = vmax.f32 %v120_v37, -100.0  ;;  %v135_v43 = vmul.f32 %v133_v35, %v129_v38  ;;  %v128_v44 = vmul.f32 0.6931472, %v190_v39 }
  0xc1   :  { %v137_v47 = vadd.f32 %v135_v43, %v131_v41  ;;  %v130_v48 = vmax.f32 %v128_v44, -100.0  ;;  %v132_v50 = vmul.f32 %v122_v42, %v116_v36 }
  0xc3   :  { %v139_v51 = vsub.f32 0.0, %v137_v47  ;;  %v136_v52 = vmul.f32 %v134_v46, %v130_v48 }
  0xc5   :  { %v138_v53 = vadd.f32 %v136_v52, %v132_v50  ;;  %v141_v54 = vsel %vm95_vm6, %v139_v51, 0.0 }
  0xc6   :  { %v144_v57 = vsel %vm143_vm7, %v141_v54, 0.0 }
  0xc7   :  { %v140_v55 = vsub.f32 0.0, %v138_v53 }
  0xc9   :  { %v142_v56 = vsel %vm96_vm8, %v140_v55, 0.0 }
  0xca   :  { %v145_v58 = vsel %vm143_vm7, %v142_v56, 0.0 }
  0xcb   :  { %v146_v59 = vadd.f32 %v145_v58, %v144_v57 }
  0xcd   :  { %147 = vst.msk [vmem:[#allocation5] sm:$0xff] %vm143_vm7, %v146_v59 }
  0xce PF:  { %150 = sbr.rel (%p300_p2) target bundleno = 213 (0xd5), region = 29  ;;  %vm151_vm9 = vcmask (!%p300_p2), 64512   ;;  %v243_v60 = vmov (!%p300_p2), 0.0  }
  0xcf   :  { %152 = vst.msk [vmem:[#allocation5] sm:$0xff] (!%p300_p2), %vm151_vm9, %v243_v60 }
  0xd5 PF:  { %s244_s2 = smov [#allocation5]  }
  0xd6   :  { %s159_s3 = sshll.u32 %s244_s2, 4  ;;  %s160_s3 = int_to_ptr.vmem [resolvable:$true] %s159_s3 }
  0xd7   :  { %s213_s12 = scalar_lea.vmem %s160_s3, 128  ;;  %p218_p4 = scmp.lt.s32.totalorder %s160_s3, %s160_s3 }
  0xd8   :  { %p214_p3 = scmp.ne.s32.totalorder %s160_s3, %s213_s12  ;;  %p219_p5 = scmp.lt.s32.totalorder %s213_s12, %s213_s12 }
  0xda   :  { %p220_p6 = por %p219_p5, %p218_p4 }
  0xdc   :  { %p221_p7 = pnand %p220_p6, %p214_p3 }
  0xde   :  { %224 = shalt.err (!%p221_p7)
}
  0xdf   :  { %s225_s15 = scalar_lea.hbm %s356_s7, 128 }
  0xe0   :  { %p226_p8 = scmp.ne.s32.totalorder %s356_s7, %s225_s15  ;;  %p229_p9 = scmp.lt.u32.totalorder %s225_s15, %s356_s7 }
  0xe2   :  { %p231_p10 = pnand %p229_p9, %p226_p8 }
  0xe4   :  { %234 = shalt.err (!%p231_p10)
}
  0xe5   :  { %162 = dma.vmem_to_hbm [thread:$0]  %s160_s3, 128, %s356_s7, [#allocation6]  }
  0xe6   :  { %237 = dma.done.wait [#allocation6], 128  }
  0xe7   :  { %238 = vsyncadd [#allocation6], 4294967168 }
  0xe8   :  { %166 = vsyncpa [#allocation6], 1 }

</bundles_post_ra>
